<compile_context>
chip_gen: v6e
topology: v6e:2x2x1
jax: 0.10.0
libtpu: 0.0.40
codegen_flags: <defaults>
</compile_context>

<pallas_src>
import jax
import jax.numpy as jnp
import numpy as np
from jax.experimental import pallas as pl
from jax.experimental.pallas import tpu as pltpu

VOCAB = 100
EMBED = 32       # embedding_dim
HIDDEN = 32      # hidden_size
DROPOUT_P = 0.1  # inference mode -> identity
H2 = 2 * HIDDEN  # per-gate fused width (fwd|bwd)
H6 = 6 * HIDDEN  # all three gates, both directions


def encoder_gru_kernel(tok_ref, emb_ref, h_ref, wih_ref, whh_ref, bih_ref, bhh_ref, out_ref):
    """Embedding row gather + one bidirectional GRU step (seq_len=1, batch=1).

    tok_ref : SMEM (1,)            int32   token id
    emb_ref : VMEM (VOCAB, E)      f32     embedding table
    h_ref   : VMEM (1, 2H)         f32     [h_fwd | h_bwd]
    wih_ref : VMEM (E, 6H)         f32     fused input weights   [r_f r_b z_f z_b n_f n_b]
    whh_ref : VMEM (2H, 6H)        f32     block-diag hidden weights, same column order
    bih/bhh : VMEM (1, 6H)         f32     fused biases
    out_ref : VMEM (1, 2H)         f32     new [h_fwd | h_bwd]
    """
    tok = tok_ref[0]
    # embedding lookup; nn.Dropout(p) in eval mode is identity.
    # TODO(synk): training-mode dropout (pltpu.prng_seed/prng_random_bits mask, scaled by
    #             1/(1-p)) not implemented; inference => identity.
    x = emb_ref[pl.ds(tok, 1), :]                                   # (1, E)
    h2 = h_ref[...]                                                 # (1, 2H)

    gi = jnp.dot(x, wih_ref[...], preferred_element_type=jnp.float32) + bih_ref[...]   # (1, 6H)
    gh = jnp.dot(h2, whh_ref[...], preferred_element_type=jnp.float32) + bhh_ref[...]  # (1, 6H)

    i_r, i_z, i_n = gi[:, 0:H2], gi[:, H2:2 * H2], gi[:, 2 * H2:3 * H2]
    h_r, h_z, h_n = gh[:, 0:H2], gh[:, H2:2 * H2], gh[:, 2 * H2:3 * H2]

    r = jax.nn.sigmoid(i_r + h_r)
    z = jax.nn.sigmoid(i_z + h_z)
    n = jnp.tanh(i_n + r * h_n)

    out_ref[...] = (1.0 - z) * n + z * h2                           # single (1, 2H) store


@jax.jit
def encoder_rnn_forward(kparams, encoder_input, hidden):
    """Mirrors EncoderRNN.forward(encoder_input, hidden).

    encoder_input: scalar int token id
    hidden:        (2, 1, H) f32  (num_directions, batch, hidden)
    returns (output (1, 1, 2H), hidden (2, 1, H))
    """
    tok = jnp.asarray(encoder_input, jnp.int32).reshape(1)
    h2 = hidden.reshape(1, H2)                                       # contiguous: [h_fwd | h_bwd]

    h2_new = pl.pallas_call(
        encoder_gru_kernel,
        out_shape=jax.ShapeDtypeStruct((1, H2), jnp.float32),
        in_specs=[
            pl.BlockSpec(memory_space=pltpu.MemorySpace.SMEM),   # token id
            pl.BlockSpec(memory_space=pltpu.MemorySpace.VMEM),   # embedding table
            pl.BlockSpec(memory_space=pltpu.MemorySpace.VMEM),   # h2
            pl.BlockSpec(memory_space=pltpu.MemorySpace.VMEM),   # W_ih fused
            pl.BlockSpec(memory_space=pltpu.MemorySpace.VMEM),   # W_hh block-diag
            pl.BlockSpec(memory_space=pltpu.MemorySpace.VMEM),   # b_ih fused
            pl.BlockSpec(memory_space=pltpu.MemorySpace.VMEM),   # b_hh fused
        ],
        out_specs=pl.BlockSpec(memory_space=pltpu.MemorySpace.VMEM),
    )(tok, kparams["embedding"], h2, kparams["w_ih"], kparams["w_hh"],
      kparams["b_ih"], kparams["b_hh"])

    # output[t=0] = concat(h_fwd_new, h_bwd_new) == the kernel's single output row.
    output = h2_new.reshape(1, 1, H2)       # (seq, batch, 2H)
    hidden_new = h2_new.reshape(2, 1, HIDDEN)  # (num_directions, batch, H) -- contiguous bitcast
    return output, hidden_new


def init_params(key):
    """Raw PyTorch-layout params + fused lane-dense layouts for the kernel."""
    k_emb, k_wih, k_whh, k_bih, k_bhh = jax.random.split(key, 5)
    bound = 1.0 / np.sqrt(HIDDEN)
    # PyTorch nn.GRU stores weight_ih_l0{,_reverse} as (3H, E) with gate row order (r, z, n);
    # keep raw as (dir, gate, H, in).
    w_ih = jax.random.uniform(k_wih, (2, 3, HIDDEN, EMBED), jnp.float32, -bound, bound)
    w_hh = jax.random.uniform(k_whh, (2, 3, HIDDEN, HIDDEN), jnp.float32, -bound, bound)
    b_ih = jax.random.uniform(k_bih, (2, 3, HIDDEN), jnp.float32, -bound, bound)
    b_hh = jax.random.uniform(k_bhh, (2, 3, HIDDEN), jnp.float32, -bound, bound)
    embedding = jax.random.normal(k_emb, (VOCAB, EMBED), jnp.float32)

    # Fused column layout: block index (2*g + d), g in {r,z,n}, d in {fwd,bwd}
    #   -> columns [r_f | r_b | z_f | z_b | n_f | n_b], each H wide.
    w_ih_fused = jnp.concatenate(
        [w_ih[d, g].T for g in range(3) for d in range(2)], axis=1)          # (E, 6H)
    b_ih_fused = jnp.concatenate(
        [b_ih[d, g] for g in range(3) for d in range(2)], axis=0).reshape(1, H6)
    b_hh_fused = jnp.concatenate(
        [b_hh[d, g] for g in range(3) for d in range(2)], axis=0).reshape(1, H6)

    # Block-diagonal hidden weights: rows d*H:(d+1)*H only feed that direction's columns.
    w_hh_blk = jnp.zeros((H2, H6), jnp.float32)
    for d in range(2):
        for g in range(3):
            col = (2 * g + d) * HIDDEN
            w_hh_blk = w_hh_blk.at[d * HIDDEN:(d + 1) * HIDDEN, col:col + HIDDEN].set(w_hh[d, g].T)

    kernel_params = {
        "embedding": embedding,
        "w_ih": w_ih_fused,      # (32, 192)
        "w_hh": w_hh_blk,        # (64, 192)
        "b_ih": b_ih_fused,      # (1, 192)
        "b_hh": b_hh_fused,      # (1, 192)
    }
    raw_params = {"embedding": embedding, "w_ih": w_ih, "w_hh": w_hh,
                  "b_ih": b_ih, "b_hh": b_hh}
    return kernel_params, raw_params


def reference_forward(raw, encoder_input, hidden):
    """Pure-JAX reference of the same bidirectional GRU step (PyTorch gate semantics)."""
    x = raw["embedding"][encoder_input].reshape(1, EMBED)
    hs = []
    for d in range(2):
        h = hidden[d]                                               # (1, H)
        gi = [x @ raw["w_ih"][d, g].T + raw["b_ih"][d, g] for g in range(3)]
        gh = [h @ raw["w_hh"][d, g].T + raw["b_hh"][d, g] for g in range(3)]
        r = jax.nn.sigmoid(gi[0] + gh[0])
        z = jax.nn.sigmoid(gi[1] + gh[1])
        n = jnp.tanh(gi[2] + r * gh[2])
        hs.append((1.0 - z) * n + z * h)
    hnew = jnp.stack(hs, axis=0)                                    # (2, 1, H)
    output = jnp.concatenate([hs[0], hs[1]], axis=-1).reshape(1, 1, H2)
    return output, hnew


if __name__ == "__main__":
    key = jax.random.PRNGKey(0)
    k_params, k_hidden = jax.random.split(key, 2)
    kernel_params, raw_params = init_params(k_params)

    encoder_input = jnp.array(7, dtype=jnp.int32)                        # one token id
    hidden = 0.1 * jax.random.normal(k_hidden, (2, 1, HIDDEN), jnp.float32)

    output, new_hidden = encoder_rnn_forward(kernel_params, encoder_input, hidden)
    output = jax.block_until_ready(output)
    new_hidden = jax.block_until_ready(new_hidden)

    ref_out, ref_hid = reference_forward(raw_params, encoder_input, hidden)
    assert output.shape == (1, 1, H2)
    assert new_hidden.shape == (2, 1, HIDDEN)
    np.testing.assert_allclose(np.asarray(output), np.asarray(ref_out), rtol=1e-5, atol=1e-5)
    np.testing.assert_allclose(np.asarray(new_hidden), np.asarray(ref_hid), rtol=1e-5, atol=1e-5)

    print("KERNEL_OK")
</pallas_src>

<mosaic_0001>
module attributes {stable_mosaic.version = 11 : i64} {
  func.func @encoder_gru_kernel(%arg0: memref<1xi32, #tpu.memory_space<smem>>, %arg1: memref<100x32xf32, #tpu.memory_space<vmem>>, %arg2: memref<1x64xf32, #tpu.memory_space<vmem>>, %arg3: memref<32x192xf32, #tpu.memory_space<vmem>>, %arg4: memref<64x192xf32, #tpu.memory_space<vmem>>, %arg5: memref<1x192xf32, #tpu.memory_space<vmem>>, %arg6: memref<1x192xf32, #tpu.memory_space<vmem>>, %arg7: memref<1x64xf32, #tpu.memory_space<vmem>>) attributes {dimension_semantics = [], scalar_prefetch = 0 : i64, scratch_operands = 0 : i64, tpu.core_type = #tpu.core_type<tc>} {
    %c0 = arith.constant 0 : index
    %0 = memref.load %arg0[%c0] : memref<1xi32, #tpu.memory_space<smem>>
    %1 = arith.index_cast %0 : i32 to index
    %c0_0 = arith.constant 0 : index
    %2 = vector.load %arg1[%1, %c0_0] : memref<100x32xf32, #tpu.memory_space<vmem>>, vector<1x32xf32>
    %c0_1 = arith.constant 0 : index
    %c0_2 = arith.constant 0 : index
    %3 = vector.load %arg2[%c0_1, %c0_2] : memref<1x64xf32, #tpu.memory_space<vmem>>, vector<1x64xf32>
    %c0_3 = arith.constant 0 : index
    %c0_4 = arith.constant 0 : index
    %4 = vector.load %arg3[%c0_3, %c0_4] : memref<32x192xf32, #tpu.memory_space<vmem>>, vector<32x192xf32>
    %cst = arith.constant dense<0.000000e+00> : vector<1x192xf32>
    %5 = tpu.matmul %2, %4, %cst {dimension_numbers = #tpu.dot_dimension_numbers<[1], [0], [0], [1], [0, 0, 1, 1], [], []>} : vector<1x32xf32>, vector<32x192xf32>, vector<1x192xf32> -> vector<1x192xf32>
    %c0_5 = arith.constant 0 : index
    %c0_6 = arith.constant 0 : index
    %6 = vector.load %arg5[%c0_5, %c0_6] : memref<1x192xf32, #tpu.memory_space<vmem>>, vector<1x192xf32>
    %7 = arith.addf %5, %6 : vector<1x192xf32>
    %c0_7 = arith.constant 0 : index
    %c0_8 = arith.constant 0 : index
    %8 = vector.load %arg4[%c0_7, %c0_8] : memref<64x192xf32, #tpu.memory_space<vmem>>, vector<64x192xf32>
    %cst_9 = arith.constant dense<0.000000e+00> : vector<1x192xf32>
    %9 = tpu.matmul %3, %8, %cst_9 {dimension_numbers = #tpu.dot_dimension_numbers<[1], [0], [0], [1], [0, 0, 1, 1], [], []>} : vector<1x64xf32>, vector<64x192xf32>, vector<1x192xf32> -> vector<1x192xf32>
    %c0_10 = arith.constant 0 : index
    %c0_11 = arith.constant 0 : index
    %10 = vector.load %arg6[%c0_10, %c0_11] : memref<1x192xf32, #tpu.memory_space<vmem>>, vector<1x192xf32>
    %11 = arith.addf %9, %10 : vector<1x192xf32>
    %12 = vector.extract_strided_slice %7 {offsets = [0, 0], sizes = [1, 64], strides = [1, 1]} : vector<1x192xf32> to vector<1x64xf32>
    %13 = vector.extract_strided_slice %7 {offsets = [0, 64], sizes = [1, 64], strides = [1, 1]} : vector<1x192xf32> to vector<1x64xf32>
    %14 = vector.extract_strided_slice %7 {offsets = [0, 128], sizes = [1, 64], strides = [1, 1]} : vector<1x192xf32> to vector<1x64xf32>
    %15 = vector.extract_strided_slice %11 {offsets = [0, 0], sizes = [1, 64], strides = [1, 1]} : vector<1x192xf32> to vector<1x64xf32>
    %16 = vector.extract_strided_slice %11 {offsets = [0, 64], sizes = [1, 64], strides = [1, 1]} : vector<1x192xf32> to vector<1x64xf32>
    %17 = vector.extract_strided_slice %11 {offsets = [0, 128], sizes = [1, 64], strides = [1, 1]} : vector<1x192xf32> to vector<1x64xf32>
    %18 = arith.addf %12, %15 : vector<1x64xf32>
    %19 = arith.negf %18 : vector<1x64xf32>
    %20 = math.exp %19 : vector<1x64xf32>
    %cst_12 = arith.constant 1.000000e+00 : f32
    %21 = vector.broadcast %cst_12 : f32 to vector<1x64xf32>
    %22 = arith.addf %21, %20 : vector<1x64xf32>
    %23 = arith.divf %21, %22 : vector<1x64xf32>
    %24 = arith.addf %13, %16 : vector<1x64xf32>
    %25 = arith.negf %24 : vector<1x64xf32>
    %26 = math.exp %25 : vector<1x64xf32>
    %cst_13 = arith.constant 1.000000e+00 : f32
    %27 = vector.broadcast %cst_13 : f32 to vector<1x64xf32>
    %28 = arith.addf %27, %26 : vector<1x64xf32>
    %29 = arith.divf %27, %28 : vector<1x64xf32>
    %30 = arith.mulf %23, %17 : vector<1x64xf32>
    %31 = arith.addf %14, %30 : vector<1x64xf32>
    %32 = math.tanh %31 : vector<1x64xf32>
    %cst_14 = arith.constant 1.000000e+00 : f32
    %33 = vector.broadcast %cst_14 : f32 to vector<1x64xf32>
    %34 = arith.subf %33, %29 : vector<1x64xf32>
    %35 = arith.mulf %34, %32 : vector<1x64xf32>
    %36 = arith.mulf %29, %3 : vector<1x64xf32>
    %37 = arith.addf %35, %36 : vector<1x64xf32>
    %c0_15 = arith.constant 0 : index
    %c0_16 = arith.constant 0 : index
    %38 = vector.load %arg7[%c0_15, %c0_16] : memref<1x64xf32, #tpu.memory_space<vmem>>, vector<1x64xf32>
    tpu.vector_store %arg7[%c0_15, %c0_16], %37 {strides = array<i32>} : memref<1x64xf32, #tpu.memory_space<vmem>>, vector<1x64xf32>,
    return
  }
}

</mosaic_0001>

<bundles_post_ra>
// kernel: encoder_rnn_forward.1
= control target key start
LH: loop header
LB: loop body
LE: loop exit
PB: predicated region body
PF: predicated region fallthrough
CT: control target
= control target key end

     0   :  { %13 = vsyncpa [#allocation4], 0  ;;  %s316_s24 = smov [#allocation3]   ;;  %s430_s0 = inlined_call_operand.<no memory space> [shape: s32[1], index: 0, kind: input, shape index: {}]   ;;  %s431_s1 = inlined_call_operand.vmem [shape: f32[100,32], index: 1, kind: input, shape index: {}]   ;;  %s432_s2 = inlined_call_operand.vmem [shape: f32[1,64], index: 2, kind: input, shape index: {}]   ;;  %s433_s3 = inlined_call_operand.hbm [shape: f32[32,192], index: 3, kind: input, shape index: {}]   ;;  %s434_s4 = inlined_call_operand.vmem [shape: f32[64,192], index: 4, kind: input, shape index: {}]   ;;  %s435_s5 = inlined_call_operand.vmem [shape: f32[1,192], index: 5, kind: input, shape index: {}]   ;;  %s436_s6 = inlined_call_operand.vmem [shape: f32[1,192], index: 6, kind: input, shape index: {}]   ;;  %s437_s7 = inlined_call_operand.vmem [shape: f32[1,64], index: 7, kind: output, shape index: {}]  }
   0x1   :  { %s25_s25 = sshll.u32 %s316_s24, 4  ;;  %s26_s25 = int_to_ptr.vmem [resolvable:$true] %s25_s25 }
   0x2   :  { %s302_s26 = scalar_lea.vmem %s26_s25, 1024  ;;  %p307_p1 = scmp.lt.s32.totalorder %s26_s25, %s26_s25 }
   0x3   :  { %p303_p0 = scmp.ne.s32.totalorder %s26_s25, %s302_s26  ;;  %p308_p2 = scmp.lt.s32.totalorder %s302_s26, %s302_s26 }
   0x5   :  { %p309_p3 = por %p308_p2, %p307_p1 }
   0x7   :  { %p310_p4 = pnand %p309_p3, %p303_p0 }
   0x9   :  { %313 = shalt.err (!%p310_p4)
}
   0xa   :  { %s317_s27 = smov 256   ;;  %s318_s28 = smov 16  }
   0xb   :  { %31 = dma.hbm_to_vmem [thread:$0]  %s433_s3, 1024, %s26_s25, [#allocation4], %s317_s27, %s317_s27, %s318_s28  }
   0xc   :  { %314 = dma.done.wait [#allocation4], 1024  }
   0xd   :  { %315 = vsyncadd [#allocation4], 4294966272  ;;  %v319_v0 = vmov 0.0   ;;  %v155_v1 = vld [vmem:[%s434_s4 + $0x78] sm:$0xff]  ;;  %v154_v2 = vld [vmem:[%s434_s4 + $0x70] sm:$0xff]  ;;  %s42_s27 = scalar_lea.vmem %s431_s1, %s430_s0  ;;  %vm65_vm0 = vcmask 261120   ;;  %v55_v27 = vlaneseq }
   0xe   :  { %133 = vmatprep.mubr.f32.mxu0 %v319_v0  ;;  %236 = vmatprep.mubr.f32.mxu1 %v319_v0  ;;  %v153_v3 = vld [vmem:[%s434_s4 + $0x68] sm:$0xff]  ;;  %v152_v4 = vld [vmem:[%s434_s4 + $0x60] sm:$0xff]  ;;  %v151_v5 = vld [vmem:[%s434_s4 + $0x58] sm:$0xff]  ;;  %vm168_vm1 = vcmask 523264   ;;  %vm272_vm2 = vcmask 516096  }
   0xf   :  { %188 = vmatprep.subr.mxu1 %v155_v1  ;;  %v52_v6 = vld [vmem:[#allocation3 + $0x38] sm:$0xff]  ;;  %v51_v7 = vld [vmem:[#allocation3 + $0x30] sm:$0xff]  ;;  %v50_v9 = vld [vmem:[#allocation3 + $0x28] sm:$0xff]  ;;  %v56_v28 = vshrl.u32 %v55_v27, 7 }
  0x10   :  { %189 = vmatpush1.msra.mxu1 %v154_v2  ;;  %v150_v8 = vld [vmem:[%s434_s4 + $0x50] sm:$0xff]  ;;  %93 = vmatprep.subr.mxu0 %v52_v6  ;;  %v149_v10 = vld [vmem:[%s434_s4 + $0x48] sm:$0xff]  ;;  %v49_v11 = vld [vmem:[#allocation3 + $0x20] sm:$0xff] }
  0x11   :  { %190 = vmatprep.subr.mxu1 %v153_v3  ;;  %94 = vmatpush1.msra.mxu0 %v51_v7  ;;  %v48_v12 = vld [vmem:[#allocation3 + $0x18] sm:$0xff]  ;;  %v148_v13 = vld [vmem:[%s434_s4 + $0x40] sm:$0xff]  ;;  %v47_v14 = vld [vmem:[#allocation3 + $0x10] sm:$0xff]  ;;  %v57_v29 = vsub.s32 0, %v56_v28  ;;  %v61_v42 = vsub.s32 1, %v56_v28 }
  0x12   :  { %191 = vmatpush1.msra.mxu1 %v152_v4  ;;  %95 = vmatprep.subr.mxu0 %v50_v9  ;;  %v147_v15 = vld [vmem:[%s434_s4 + $0x38] sm:$0xff]  ;;  %v46_v16 = vld [vmem:[#allocation3 + $0x8] sm:$0xff]  ;;  %v146_v17 = vld [vmem:[%s434_s4 + $0x30] sm:$0xff] }
  0x13   :  { %192 = vmatprep.subr.mxu1 %v151_v5  ;;  %96 = vmatpush1.msra.mxu0 %v49_v11  ;;  %v45_v18 = vld [vmem:[#allocation3] sm:$0xff]  ;;  %v145_v19 = vld [vmem:[%s434_s4 + $0x28] sm:$0xff]  ;;  %v143_v22 = vld [vmem:[%s434_s4 + $0x18] sm:$0xff] }
  0x14   :  { %193 = vmatpush1.msra.mxu1 %v150_v8  ;;  %97 = vmatprep.subr.mxu0 %v48_v12  ;;  %v43_v20 = vld [vmem:[%s42_s27] sm:$0x1]  ;;  %v142_v23 = vld [vmem:[%s434_s4 + $0x10] sm:$0xff]  ;;  %v141_v24 = vld [vmem:[%s434_s4 + $0x8] sm:$0xff] }
  0x15   :  { %194 = vmatprep.subr.mxu1 %v149_v10  ;;  %98 = vmatpush1.msra.mxu0 %v47_v14  ;;  %v144_v21 = vld [vmem:[%s434_s4 + $0x20] sm:$0xff] }
  0x16   :  { %195 = vmatpush1.msra.mxu1 %v148_v13  ;;  %99 = vmatprep.subr.mxu0 %v46_v16  ;;  %v140_v25 = vld [vmem:[%s434_s4] sm:$0xff] }
  0x17   :  { %196 = vmatprep.subr.mxu1 %v147_v15  ;;  %100 = vmatpush1.msra.mxu0 %v45_v18  ;;  %v44_v26 = vld [vmem:[%s432_s2] sm:$0x1]  ;;  %s320_s2 = smov 64  }
  0x18   :  { %197 = vmatpush1.msra.mxu1 %v146_v17  ;;  %280 = vmatmul.mubr.msk.f32.vlgmr.msra.gmra.mxu0 %vm65_vm0, %v43_v20  ;;  %v53_v30 = vld [vmem:[%s435_s5] sm:$0x3]  ;;  %v262_v53 = vrot.slane %v44_v26, %v57_v29 }
  0x19   :  { %198 = vmatprep.subr.mxu1 %v145_v19  ;;  %v156_v31 = vld [vmem:[%s436_s6] sm:$0x3]  ;;  %v58_v32 = vrot.slane %v53_v30, %v57_v29  ;;  %v62_v45 = vrot.slane %v53_v30, %v61_v42 }
  0x1a   :  { %199 = vmatpush1.msra.mxu1 %v144_v21  ;;  %v161_v33 = vrot.slane %v156_v31, %v57_v29  ;;  %v165_v43 = vrot.slane %v156_v31, %v61_v42 }
  0x1b   :  { %200 = vmatprep.subr.mxu1 %v143_v22 }
  0x1c   :  { %201 = vmatpush1.msra.mxu1 %v142_v23 }
  0x1d   :  { %202 = vmatprep.subr.mxu1 %v141_v24 }
  0x1e   :  { %203 = vmatpush1.msra.mxu1 %v140_v25 }
  0x1f   :  { %281 = vmatmul.mubr.msk.f32.vlgmr.msra.gmra.mxu1 %vm168_vm1, %v44_v26 }
  0xd8   :  { %v135_v34 = vpop.f32.mrf.mxu0 }
  0xd9   :  { %v136_v35 = vadd.f32 %v135_v34, %v58_v32 }
  0xda   :  { %v137_v46 = vpop.f32.mrf.mxu0 }
  0xdb   :  { %v138_v49 = vadd.f32 %v137_v46, %v62_v45 }
  0xdf   :  { %v238_v36 = vpop.f32.mrf.mxu1 }
  0xe0   :  { %v239_v37 = vadd.f32 %v238_v36, %v161_v33 }
  0xe1   :  { %v240_v44 = vpop.f32.mrf.mxu1 }
  0xe2   :  { %v243_v38 = vadd.f32 %v239_v37, %v136_v35  ;;  %v241_v47 = vadd.f32 %v240_v44, %v165_v43 }
  0xe4   :  { %v282_v39 = vmul.f32 -1.442695, %v243_v38 }
  0xe6   :  { %288 = vpow2.f32 %v282_v39 }
  0xf3   :  { %v289_v40 = vpop.eup %288 }
  0xf4   :  { %v247_v41 = vadd.f32 1.0, %v289_v40 }
  0xf6   :  { %290 = vrcp.f32 %v247_v41 }
 0x103   :  { %v291_v48 = vpop.eup %290 }
 0x104   :  { %v250_v50 = vmul.f32 %v291_v48, %v241_v47  ;;  %v253_v55 = vsub.f32 1.0, %v291_v48 }
 0x106   :  { %v251_v51 = vadd.f32 %v250_v50, %v138_v49 }
 0x108   :  { %292 = vtanh.f32 %v251_v51 }
 0x115   :  { %v293_v52 = vpop.eup %292 }
 0x116   :  { %255 = vrot.lane.b32.xlu0 %v293_v52, %s320_s2 }
 0x11a   :  { %263 = vrot.lane.b32.xlu0 %v262_v53, %s320_s2 }
 0x188   :  { %v256_v54 = vpop.permute.xlu0 %255 }
 0x189   :  { %v258_v57 = vmul.f32 %v256_v54, %v253_v55 }
 0x18c   :  { %v264_v56 = vpop.permute.xlu0 %263 }
 0x18d   :  { %v266_v58 = vmul.f32 %v291_v48, %v264_v56 }
 0x18f   :  { %v267_v59 = vadd.f32 %v266_v58, %v258_v57 }
 0x191   :  { %269 = vrot.lane.b32.xlu1 %v267_v59, %s320_s2 }
 0x203   :  { %v270_v60 = vpop.permute.xlu1 %269 }
 0x204   :  { %273 = vst.msk [vmem:[%s437_s7] sm:$0x1] %vm272_vm2, %v270_v60 }
 0x205   :  { %278 = vsyncpa [#allocation4], 1 }

</bundles_post_ra>
